<compile_context>
chip_gen: v7x
topology: tpu7x:2x2x1
jax: 0.10.0
libtpu: 0.0.40
codegen_flags: <defaults>
</compile_context>

<pallas_src>
import functools

import jax
import jax.numpy as jnp
from jax.experimental import pallas as pl
from jax.experimental.pallas import tpu as pltpu


# ------------------------------ VMEM budgeting --------------------------------

def _vmem_capacity_bytes():
    try:
        info = pltpu.get_tpu_info()
        for name in ("vmem_capacity_bytes", "vmem_size_bytes", "vmem_bytes"):
            v = getattr(info, name, None)
            if v:
                return int(v)
    except Exception:
        pass
    return 64 * 1024 * 1024  # conservative (v7x per-TC physical VMEM)


def _vmem_limit_bytes():
    # Leave headroom below physical capacity; cap at 96 MiB on 128 MiB parts.
    return int(min(_vmem_capacity_bytes() * 3 // 4, 96 * 1024 * 1024))


def _tile_budget_bytes():
    # Fraction of the scoped limit we allow the tile-size chooser to plan for.
    return int(_vmem_limit_bytes() * 0.6)


# ------------------------------ tiling helpers --------------------------------

def _round_up(x, m):
    return ((x + m - 1) // m) * m


def _row_align(dtype):
    """Sublane alignment: 8 rows for 4-byte, 16 for 2-byte, 32 for 1-byte."""
    itemsize = jnp.dtype(dtype).itemsize
    if itemsize >= 4:
        return 8
    if itemsize == 2:
        return 16
    return 32


def _row_tile(m, pref, align):
    """Row tile: multiple of `align`, at most the align-rounded row count."""
    return min(_round_up(pref, align), _round_up(m, align))


def _dim_tile(d, prefs):
    """Lane-dim tile: prefer large MXU/lane-friendly divisors of d, else the
    full dim (legal because it equals the array extent; stores get masked)."""
    for p in prefs:
        if d >= p and d % p == 0:
            return p
    return d


def _shrink_rows(tm, align, footprint_fn, budget):
    while tm > align and footprint_fn(tm) > budget:
        tm = max(_round_up(tm // 2, align), align)
    return tm


def _itemsize(dtype):
    return jnp.dtype(dtype).itemsize


# ----------------------------- LayerNorm kernel -------------------------------

def _layernorm_kernel(x_ref, g_ref, b_ref, o_ref, *, eps):
    # x_ref: (tm, D) tile of rows; g_ref/b_ref: (1, D) affine params.
    x = x_ref[...].astype(jnp.float32)
    d = x.shape[-1]
    inv_d = 1.0 / d
    mean = jnp.sum(x, axis=-1, keepdims=True) * inv_d
    msq = jnp.sum(x * x, axis=-1, keepdims=True) * inv_d
    var = jnp.maximum(msq - mean * mean, 0.0)           # one-pass stats
    inv = jax.lax.rsqrt(var + eps)
    scale = inv * g_ref[...].astype(jnp.float32)         # fold gamma into inv
    y = (x - mean) * scale + b_ref[...].astype(jnp.float32)
    o_ref[...] = y.astype(o_ref.dtype)


def layernorm(x, gamma, beta, *, eps=1e-5, tm=1024):
    """LayerNorm over the last axis of x (any leading shape)."""
    orig_shape = x.shape
    d = orig_shape[-1]
    x2 = x.reshape(-1, d)
    m = x2.shape[0]

    align = _row_align(x.dtype)
    xb = _itemsize(x.dtype)
    budget = _tile_budget_bytes()

    def footprint(t):
        # double-buffered input + double-buffered output tiles
        return 2 * t * d * xb + 2 * t * d * xb

    tm = _shrink_rows(_row_tile(m, tm, align), align, footprint, budget)

    g2 = gamma.reshape(1, d)
    b2 = beta.reshape(1, d)

    out = pl.pallas_call(
        functools.partial(_layernorm_kernel, eps=eps),
        out_shape=jax.ShapeDtypeStruct((m, d), x.dtype),
        grid_spec=pltpu.PrefetchScalarGridSpec(
            num_scalar_prefetch=0,
            grid=(pl.cdiv(m, tm),),
            in_specs=[
                pl.BlockSpec((tm, d), lambda i: (i, 0)),
                pl.BlockSpec((1, d), lambda i: (0, 0)),
                pl.BlockSpec((1, d), lambda i: (0, 0)),
            ],
            out_specs=pl.BlockSpec((tm, d), lambda i: (i, 0)),
        ),
        compiler_params=pltpu.CompilerParams(
            dimension_semantics=("parallel",),
            vmem_limit_bytes=_vmem_limit_bytes()),
    )(x2, g2, b2)
    return out.reshape(orig_shape)


# --------------------------- tiled Linear kernels ------------------------------
# y = x @ W_t + b with W_t pre-transposed to (D_in, D_out) at init.

def _linear_kernel_acc_scratch(x_ref, w_ref, b_ref, o_ref, acc_ref):
    """General path: f32 VMEM accumulator, cast on the final k step."""
    k = pl.program_id(2)

    @pl.when(k == 0)
    def _():
        acc_ref[...] = jnp.zeros_like(acc_ref)

    acc_ref[...] += jnp.dot(x_ref[...], w_ref[...],
                            preferred_element_type=jnp.float32)

    @pl.when(k == pl.num_programs(2) - 1)
    def _():
        o_ref[...] = (acc_ref[...] + b_ref[...].astype(jnp.float32)
                      ).astype(o_ref.dtype)


def _linear_kernel_f32_out(x_ref, w_ref, b_ref, o_ref):
    """f32 output: accumulate directly into the resident output block
    (no scratch, no final copy)."""
    k = pl.program_id(2)

    @pl.when(k == 0)
    def _():
        o_ref[...] = jnp.zeros_like(o_ref)

    o_ref[...] += jnp.dot(x_ref[...], w_ref[...],
                          preferred_element_type=jnp.float32)

    @pl.when(k == pl.num_programs(2) - 1)
    def _():
        o_ref[...] += b_ref[...].astype(jnp.float32)


def linear(x, weight_t, bias, *, tm=512, tn=512, tk=512):
    """nn.Linear semantics with weight already transposed: x @ weight_t + bias."""
    orig_shape = x.shape
    d_in, d_out = weight_t.shape
    x2 = x.reshape(-1, d_in)
    m = x2.shape[0]

    align = _row_align(x.dtype)
    xb = _itemsize(x.dtype)
    wb = _itemsize(weight_t.dtype)
    ob = _itemsize(x.dtype)
    budget = _tile_budget_bytes()

    # Whole-weight VMEM residency when it fits comfortably: W is DMA'd once
    # instead of once per row tile (dominant traffic for long sequences).
    if d_in * d_out * wb * 2 <= budget // 2:
        tk_sel, tn_sel = d_in, d_out
    else:
        tn_sel = _dim_tile(d_out, (tn, 512, 256, 128))
        tk_sel = _dim_tile(d_in, (tk, 512, 256, 128))

    out_is_f32 = jnp.dtype(x.dtype) == jnp.dtype(jnp.float32)
    acc_bytes = 0 if out_is_f32 else 1  # counted below via tm*tn*4

    def footprint(t):
        return (2 * t * tk_sel * xb            # double-buffered x tile
                + 2 * tk_sel * tn_sel * wb     # double-buffered W tile
                + 2 * t * tn_sel * ob          # double-buffered out tile
                + acc_bytes * t * tn_sel * 4)  # f32 accumulator scratch

    tm_sel = _shrink_rows(_row_tile(m, tm, align), align, footprint, budget)

    b2 = bias.reshape(1, d_out)
    grid = (pl.cdiv(m, tm_sel), d_out // tn_sel, d_in // tk_sel)
    in_specs = [
        pl.BlockSpec((tm_sel, tk_sel), lambda i, j, k: (i, k)),
        pl.BlockSpec((tk_sel, tn_sel), lambda i, j, k: (k, j)),
        pl.BlockSpec((1, tn_sel), lambda i, j, k: (0, j)),
    ]
    out_spec = pl.BlockSpec((tm_sel, tn_sel), lambda i, j, k: (i, j))
    cparams = pltpu.CompilerParams(
        dimension_semantics=("parallel", "parallel", "arbitrary"),
        vmem_limit_bytes=_vmem_limit_bytes())

    if out_is_f32:
        kernel = _linear_kernel_f32_out
        scratch_shapes = []
    else:
        kernel = _linear_kernel_acc_scratch
        scratch_shapes = [pltpu.VMEM((tm_sel, tn_sel), jnp.float32)]

    out = pl.pallas_call(
        kernel,
        out_shape=jax.ShapeDtypeStruct((m, d_out), x.dtype),
        grid_spec=pltpu.PrefetchScalarGridSpec(
            num_scalar_prefetch=0,
            grid=grid,
            in_specs=in_specs,
            out_specs=out_spec,
            scratch_shapes=scratch_shapes,
        ),
        compiler_params=cparams,
    )(x2, weight_t, b2)
    return out.reshape(orig_shape[:-1] + (d_out,))


# ------------------------- fused PreNorm + Linear ------------------------------
# LayerNorm needs full rows, so D_in stays un-tiled inside the fused kernel.
# The normalized tile h is cached in a VMEM scratch (in the matmul input dtype)
# and computed only at j == 0; all output-column tiles j reuse it.

def _prenorm_linear_kernel(x_ref, g_ref, b_ref, w_ref, bias_ref, o_ref, h_ref,
                           *, eps):
    @pl.when(pl.program_id(1) == 0)
    def _():
        x = x_ref[...].astype(jnp.float32)
        d = x.shape[-1]
        inv_d = 1.0 / d
        mean = jnp.sum(x, axis=-1, keepdims=True) * inv_d
        msq = jnp.sum(x * x, axis=-1, keepdims=True) * inv_d
        var = jnp.maximum(msq - mean * mean, 0.0)       # one-pass stats
        inv = jax.lax.rsqrt(var + eps)
        scale = inv * g_ref[...].astype(jnp.float32)     # fold gamma into inv
        h = (x - mean) * scale + b_ref[...].astype(jnp.float32)
        h_ref[...] = h.astype(h_ref.dtype)               # cache in matmul dtype

    acc = jnp.dot(h_ref[...], w_ref[...], preferred_element_type=jnp.float32)
    o_ref[...] = (acc + bias_ref[...].astype(jnp.float32)).astype(o_ref.dtype)


def _fused_tiles(m, d_in, d_out, x_dtype, w_dtype, out_dtype):
    align = _row_align(x_dtype)
    xb = _itemsize(x_dtype)
    wb = _itemsize(w_dtype)
    ob = _itemsize(out_dtype)
    budget = _tile_budget_bytes()
    tn = _dim_tile(d_out, (512, 256, 128))

    def footprint(t):
        return (2 * t * d_in * xb          # double-buffered x tile
                + 2 * d_in * tn * wb       # double-buffered W tile
                + 2 * t * tn * ob          # double-buffered out tile
                + t * d_in * wb            # h cache scratch
                + 2 * t * d_in * 4)        # LN f32 temporaries headroom

    tm = _shrink_rows(_row_tile(m, 512, align), align, footprint, budget)
    feasible = footprint(tm) <= budget
    return tm, tn, feasible


def prenorm_linear(x, gamma, beta, weight_t, bias, *, eps=1e-5):
    orig_shape = x.shape
    d_in, d_out = weight_t.shape
    x2 = x.reshape(-1, d_in)
    m = x2.shape[0]

    tm, tn, _ = _fused_tiles(m, d_in, d_out, x.dtype, weight_t.dtype, x.dtype)

    g2 = gamma.reshape(1, d_in)
    b2 = beta.reshape(1, d_in)
    bias2 = bias.reshape(1, d_out)

    out = pl.pallas_call(
        functools.partial(_prenorm_linear_kernel, eps=eps),
        out_shape=jax.ShapeDtypeStruct((m, d_out), x.dtype),
        grid_spec=pltpu.PrefetchScalarGridSpec(
            num_scalar_prefetch=0,
            grid=(pl.cdiv(m, tm), d_out // tn),
            in_specs=[
                pl.BlockSpec((tm, d_in), lambda i, j: (i, 0)),
                pl.BlockSpec((1, d_in), lambda i, j: (0, 0)),
                pl.BlockSpec((1, d_in), lambda i, j: (0, 0)),
                pl.BlockSpec((d_in, tn), lambda i, j: (0, j)),
                pl.BlockSpec((1, tn), lambda i, j: (0, j)),
            ],
            out_specs=pl.BlockSpec((tm, tn), lambda i, j: (i, j)),
            scratch_shapes=[pltpu.VMEM((tm, d_in), weight_t.dtype)],
        ),
        compiler_params=pltpu.CompilerParams(
            dimension_semantics=("parallel", "arbitrary"),
            vmem_limit_bytes=_vmem_limit_bytes()),
    )(x2, g2, b2, weight_t, bias2)
    return out.reshape(orig_shape[:-1] + (d_out,))


# ---------------------------------- modules ------------------------------------

class Linear:
    """nn.Linear(dim_in, dim_out). Weight is pre-transposed ONCE at init.

    For v6e/v7x production use, pass dtype=jnp.bfloat16 to feed the MXU in
    bf16 (f32 accumulation is kept inside the kernels)."""

    def __init__(self, dim_in, dim_out, key, dtype=jnp.float32):
        kw, kb = jax.random.split(key)
        w = jax.random.normal(kw, (dim_out, dim_in), dtype) * 0.02
        self.weight_t = jnp.transpose(w)          # (D_in, D_out)
        self.bias = jax.random.normal(kb, (dim_out,), dtype) * 0.02

    def __call__(self, x):
        return linear(x, self.weight_t, self.bias)


class PreNorm:
    """JAX/Pallas equivalent of the PyTorch PreNorm: fn(LayerNorm(x), **kwargs)."""

    def __init__(self, dim, fn, eps=1e-5):
        # nn.LayerNorm(dim) init: weight=1, bias=0.
        self.gamma = jnp.ones((dim,), jnp.float32)
        self.beta = jnp.zeros((dim,), jnp.float32)
        self.eps = eps
        self.fn = fn

    def __call__(self, x, **kwargs):
        # Fast path: fuse LN + matmul into one kernel when fn is a Linear and
        # the un-tiled D_in footprint fits the VMEM budget.
        if isinstance(self.fn, Linear) and not kwargs:
            d_in, d_out = self.fn.weight_t.shape
            m = 1
            for s in x.shape[:-1]:
                m *= s
            _, _, feasible = _fused_tiles(m, d_in, d_out, x.dtype,
                                          self.fn.weight_t.dtype, x.dtype)
            if feasible:
                return prenorm_linear(x, self.gamma, self.beta,
                                      self.fn.weight_t, self.fn.bias,
                                      eps=self.eps)
        # Generic path: standalone LN kernel, then arbitrary fn.
        return self.fn(layernorm(x, self.gamma, self.beta, eps=self.eps),
                       **kwargs)


if __name__ == "__main__":
    key = jax.random.PRNGKey(0)
    B, N, D = 2, 8, 32  # batch, seq, hidden

    k_x, k_fn = jax.random.split(key)
    x = jax.random.normal(k_x, (B, N, D), jnp.float32)

    fn = Linear(D, D, k_fn)
    prenorm = PreNorm(D, fn)

    # Fused path (single pallas_call: LN + Linear with cached h).
    out_fused = jax.block_until_ready(prenorm(x))

    # Generic path (standalone LN kernel + tiled Linear kernel) — same semantics.
    out_generic = jax.block_until_ready(
        fn(layernorm(x, prenorm.gamma, prenorm.beta, eps=prenorm.eps)))

    # Pure-JAX reference (gamma=1, beta=0).
    def ref(x):
        mu = jnp.mean(x, axis=-1, keepdims=True)
        var = jnp.mean((x - mu) ** 2, axis=-1, keepdims=True)
        h = (x - mu) / jnp.sqrt(var + 1e-5)
        return h @ fn.weight_t + fn.bias

    expected = ref(x)
    assert out_fused.shape == (B, N, D)
    assert jnp.allclose(out_fused, expected, atol=1e-4, rtol=1e-4)
    assert jnp.allclose(out_generic, expected, atol=1e-4, rtol=1e-4)
    print("KERNEL_OK")
</pallas_src>

<mosaic_0001>
module attributes {stable_mosaic.version = 11 : i64} {
  func.func @_prenorm_linear_kernel(%arg0: i32, %arg1: i32, %arg2: memref<16x32xf32, #tpu.memory_space<vmem>>, %arg3: memref<1x32xf32, #tpu.memory_space<vmem>>, %arg4: memref<1x32xf32, #tpu.memory_space<vmem>>, %arg5: memref<32x32xf32, #tpu.memory_space<vmem>>, %arg6: memref<1x32xf32, #tpu.memory_space<vmem>>, %arg7: memref<16x32xf32, #tpu.memory_space<vmem>>, %arg8: memref<16x32xf32, #tpu.memory_space<vmem>>) attributes {dimension_semantics = [#tpu.dimension_semantics<parallel>, #tpu.dimension_semantics<arbitrary>], iteration_bounds = array<i64: 1, 1>, scalar_prefetch = 0 : i64, scratch_operands = 1 : i64, tpu.core_type = #tpu.core_type<tc>, window_params = [{transform_indices = @transform_0, window_bounds = array<i64: 16, 32>}, {pipeline_mode = #tpu.pipeline_mode<synchronous>, transform_indices = @transform_1, window_bounds = array<i64: 1, 32>}, {pipeline_mode = #tpu.pipeline_mode<synchronous>, transform_indices = @transform_2, window_bounds = array<i64: 1, 32>}, {transform_indices = @transform_3, window_bounds = array<i64: 32, 32>}, {transform_indices = @transform_4, window_bounds = array<i64: 1, 32>}, {transform_indices = @transform_5, window_bounds = array<i64: 16, 32>}]} {
    %c0_i32 = arith.constant 0 : i32
    %0 = arith.cmpi eq, %arg1, %c0_i32 : i32
    %1 = arith.extui %0 : i1 to i32
    %c0_i32_0 = arith.constant 0 : i32
    %2 = arith.cmpi ne, %1, %c0_i32_0 : i32
    scf.if %2 {
      %c0_8 = arith.constant 0 : index
      %c0_9 = arith.constant 0 : index
      %10 = vector.load %arg2[%c0_8, %c0_9] : memref<16x32xf32, #tpu.memory_space<vmem>>, vector<16x32xf32>
      %cst_10 = arith.constant dense<0.000000e+00> : vector<16xf32>
      %11 = vector.multi_reduction <add>, %10, %cst_10 [1] : vector<16x32xf32> to vector<16xf32>
      %12 = vector.shape_cast %11 : vector<16xf32> to vector<16x1xf32>
      %cst_11 = arith.constant 3.125000e-02 : f32
      %13 = vector.broadcast %cst_11 : f32 to vector<16x1xf32>
      %14 = arith.mulf %12, %13 : vector<16x1xf32>
      %15 = arith.mulf %10, %10 : vector<16x32xf32>
      %cst_12 = arith.constant dense<0.000000e+00> : vector<16xf32>
      %16 = vector.multi_reduction <add>, %15, %cst_12 [1] : vector<16x32xf32> to vector<16xf32>
      %17 = vector.shape_cast %16 : vector<16xf32> to vector<16x1xf32>
      %cst_13 = arith.constant 3.125000e-02 : f32
      %18 = vector.broadcast %cst_13 : f32 to vector<16x1xf32>
      %19 = arith.mulf %17, %18 : vector<16x1xf32>
      %20 = arith.mulf %14, %14 : vector<16x1xf32>
      %21 = arith.subf %19, %20 : vector<16x1xf32>
      %cst_14 = arith.constant 0.000000e+00 : f32
      %22 = vector.broadcast %cst_14 : f32 to vector<16x1xf32>
      %23 = arith.maximumf %21, %22 : vector<16x1xf32>
      %cst_15 = arith.constant 9.99999974E-6 : f32
      %24 = vector.broadcast %cst_15 : f32 to vector<16x1xf32>
      %25 = arith.addf %23, %24 : vector<16x1xf32>
      %26 = math.rsqrt %25 : vector<16x1xf32>
      %c0_16 = arith.constant 0 : index
      %c0_17 = arith.constant 0 : index
      %27 = vector.load %arg3[%c0_16, %c0_17] : memref<1x32xf32, #tpu.memory_space<vmem>>, vector<1x32xf32>
      %28 = vector.broadcast %26 : vector<16x1xf32> to vector<16x32xf32>
      %29 = vector.broadcast %27 : vector<1x32xf32> to vector<16x32xf32>
      %30 = arith.mulf %28, %29 : vector<16x32xf32>
      %31 = vector.broadcast %14 : vector<16x1xf32> to vector<16x32xf32>
      %32 = arith.subf %10, %31 : vector<16x32xf32>
      %33 = arith.mulf %32, %30 : vector<16x32xf32>
      %c0_18 = arith.constant 0 : index
      %c0_19 = arith.constant 0 : index
      %34 = vector.load %arg4[%c0_18, %c0_19] : memref<1x32xf32, #tpu.memory_space<vmem>>, vector<1x32xf32>
      %35 = vector.broadcast %34 : vector<1x32xf32> to vector<16x32xf32>
      %36 = arith.addf %33, %35 : vector<16x32xf32>
      %c0_20 = arith.constant 0 : index
      %c0_21 = arith.constant 0 : index
      %37 = vector.load %arg8[%c0_20, %c0_21] : memref<16x32xf32, #tpu.memory_space<vmem>>, vector<16x32xf32>
      tpu.vector_store %arg8[%c0_20, %c0_21], %36 {strides = array<i32>} : memref<16x32xf32, #tpu.memory_space<vmem>>, vector<16x32xf32>,
    } else {
    }
    %c0 = arith.constant 0 : index
    %c0_1 = arith.constant 0 : index
    %3 = vector.load %arg8[%c0, %c0_1] : memref<16x32xf32, #tpu.memory_space<vmem>>, vector<16x32xf32>
    %c0_2 = arith.constant 0 : index
    %c0_3 = arith.constant 0 : index
    %4 = vector.load %arg5[%c0_2, %c0_3] : memref<32x32xf32, #tpu.memory_space<vmem>>, vector<32x32xf32>
    %cst = arith.constant dense<0.000000e+00> : vector<16x32xf32>
    %5 = tpu.matmul %3, %4, %cst {dimension_numbers = #tpu.dot_dimension_numbers<[1], [0], [0], [1], [0, 0, 1, 1], [], []>} : vector<16x32xf32>, vector<32x32xf32>, vector<16x32xf32> -> vector<16x32xf32>
    %c0_4 = arith.constant 0 : index
    %c0_5 = arith.constant 0 : index
    %6 = vector.load %arg6[%c0_4, %c0_5] : memref<1x32xf32, #tpu.memory_space<vmem>>, vector<1x32xf32>
    %7 = vector.broadcast %6 : vector<1x32xf32> to vector<16x32xf32>
    %8 = arith.addf %5, %7 : vector<16x32xf32>
    %c0_6 = arith.constant 0 : index
    %c0_7 = arith.constant 0 : index
    %9 = vector.load %arg7[%c0_6, %c0_7] : memref<16x32xf32, #tpu.memory_space<vmem>>, vector<16x32xf32>
    tpu.vector_store %arg7[%c0_6, %c0_7], %8 {strides = array<i32>} : memref<16x32xf32, #tpu.memory_space<vmem>>, vector<16x32xf32>,
    return
  }
  func.func @transform_0(%arg0: i32, %arg1: i32) -> (i32, i32) {
    %c0_i32 = arith.constant 0 : i32
    %c0_i32_0 = arith.constant 0 : i32
    return %arg0, %c0_i32 : i32, i32
  }
  func.func @transform_1(%arg0: i32, %arg1: i32) -> (i32, i32) {
    %c0_i32 = arith.constant 0 : i32
    %c0_i32_0 = arith.constant 0 : i32
    %c0_i32_1 = arith.constant 0 : i32
    return %c0_i32, %c0_i32_0 : i32, i32
  }
  func.func @transform_2(%arg0: i32, %arg1: i32) -> (i32, i32) {
    %c0_i32 = arith.constant 0 : i32
    %c0_i32_0 = arith.constant 0 : i32
    %c0_i32_1 = arith.constant 0 : i32
    return %c0_i32, %c0_i32_0 : i32, i32
  }
  func.func @transform_3(%arg0: i32, %arg1: i32) -> (i32, i32) {
    %c0_i32 = arith.constant 0 : i32
    %c0_i32_0 = arith.constant 0 : i32
    return %c0_i32, %arg1 : i32, i32
  }
  func.func @transform_4(%arg0: i32, %arg1: i32) -> (i32, i32) {
    %c0_i32 = arith.constant 0 : i32
    %c0_i32_0 = arith.constant 0 : i32
    return %c0_i32, %arg1 : i32, i32
  }
  func.func @transform_5(%arg0: i32, %arg1: i32) -> (i32, i32) {
    %c0_i32 = arith.constant 0 : i32
    return %arg0, %arg1 : i32, i32
  }
}

</mosaic_0001>

<bundles_post_ra>
// kernel: tpu_custom_call.1
= control target key start
LH: loop header
LB: loop body
LE: loop exit
PB: predicated region body
PF: predicated region fallthrough
CT: control target
= control target key end

     0   :  { %10 = vsyncpa [#allocation4], 0  ;;  %s433_s0 = inlined_call_operand.hbm [shape: f32[16,32], index: 0, kind: input, shape index: {}]   ;;  %s434_s1 = inlined_call_operand.vmem [shape: f32[1,32], index: 1, kind: input, shape index: {}]   ;;  %s435_s2 = inlined_call_operand.vmem [shape: f32[1,32], index: 2, kind: input, shape index: {}]   ;;  %s436_s3 = inlined_call_operand.hbm [shape: f32[32,32], index: 3, kind: input, shape index: {}]   ;;  %s437_s4 = inlined_call_operand.vmem [shape: f32[1,32], index: 4, kind: input, shape index: {}]   ;;  %s438_s5 = inlined_call_operand.hbm [shape: f32[16,32], index: 5, kind: output, shape index: {}]  }
   0x1   :  { %11 = vsyncpa [#allocation7], 0 }
   0x2   :  { %12 = vsyncpa [#allocation5], 0  ;;  %s334_s18 = smov [#allocation3]   ;;  %s262_s22 = scalar_lea.hbm %s433_s0, 256 }
   0x3   :  { %s18_s19 = sshll.u32 %s334_s18, 4  ;;  %p263_p0 = scmp.ne.s32.totalorder %s433_s0, %s262_s22  ;;  %s19_s19 = int_to_ptr.vmem [resolvable:$true] %s18_s19 }
   0x4   :  { %p266_p1 = scmp.lt.u32.totalorder %s262_s22, %s433_s0 }
   0x6   :  { %p268_p2 = pnand %p266_p1, %p263_p0 }
   0x8   :  { %271 = shalt.err (!%p268_p2)
}
   0x9   :  { %s272_s27 = scalar_lea.vmem %s19_s19, 256  ;;  %p277_p4 = scmp.lt.s32.totalorder %s19_s19, %s19_s19 }
   0xa   :  { %p273_p3 = scmp.ne.s32.totalorder %s19_s19, %s272_s27  ;;  %p278_p5 = scmp.lt.s32.totalorder %s272_s27, %s272_s27 }
   0xc   :  { %p279_p6 = por %p278_p5, %p277_p4 }
   0xe   :  { %p280_p7 = pnand %p279_p6, %p273_p3 }
  0x10   :  { %283 = shalt.err (!%p280_p7)
}
  0x11   :  { %s335_s28 = smov 128   ;;  %s336_s29 = smov 8  }
  0x12   :  { %24 = dma.hbm_to_vmem [thread:$0]  %s433_s0, 256, %s19_s19, [#allocation4], %s335_s28, %s335_s28, %s336_s29  }
  0x13   :  { %s337_s7 = smov [#allocation6]   ;;  %s284_s11 = scalar_lea.hbm %s436_s3, 512 }
  0x14   :  { %s34_s8 = sshll.u32 %s337_s7, 4  ;;  %p285_p8 = scmp.ne.s32.totalorder %s436_s3, %s284_s11  ;;  %s35_s8 = int_to_ptr.vmem [resolvable:$true] %s34_s8 }
  0x15   :  { %p288_p9 = scmp.lt.u32.totalorder %s284_s11, %s436_s3 }
  0x17   :  { %p290_p10 = pnand %p288_p9, %p285_p8 }
  0x19   :  { %293 = shalt.err (!%p290_p10)
}
  0x1a   :  { %s294_s16 = scalar_lea.vmem %s35_s8, 512  ;;  %p299_p12 = scmp.lt.s32.totalorder %s35_s8, %s35_s8 }
  0x1b   :  { %p295_p11 = scmp.ne.s32.totalorder %s35_s8, %s294_s16  ;;  %p300_p13 = scmp.lt.s32.totalorder %s294_s16, %s294_s16 }
  0x1d   :  { %p301_p0 = por %p300_p13, %p299_p12 }
  0x1f   :  { %p302_p1 = pnand %p301_p0, %p295_p11 }
  0x21   :  { %305 = shalt.err (!%p302_p1)
}
  0x22   :  { %40 = dma.hbm_to_vmem [thread:$0]  %s436_s3, 512, %s35_s8, [#allocation7], %s335_s28, %s335_s28, %s336_s29  }
  0x23   :  { %328 = dma.done.wait [#allocation4], 256  }
  0x24   :  { %329 = vsyncadd [#allocation4], 4294967040 }
  0x25   :  { %330 = dma.done.wait [#allocation7], 512  }
  0x26   :  { %331 = vsyncadd [#allocation7], 4294966784  ;;  %vm55_vm0 = vcmask 261120   ;;  %v53_v0 = vld [vmem:[#allocation3] sm:$0xff]  ;;  %v54_v1 = vld [vmem:[#allocation3 + $0x8] sm:$0xff] }
  0x27   :  { %v56_v2 = vsel %vm55_vm0, %v53_v0, 0.0  ;;  %v64_v3 = vmul.f32 %v53_v0, %v53_v0  ;;  %v65_v4 = vmul.f32 %v54_v1, %v54_v1  ;;  %v59_v6 = vsel %vm55_vm0, %v54_v1, 0.0  ;;  %v110_v8 = vld [vmem:[#allocation6] sm:$0xff]  ;;  %v111_v9 = vld [vmem:[#allocation6 + $0x8] sm:$0xff]  ;;  %v112_v11 = vld [vmem:[#allocation6 + $0x10] sm:$0xff] }
  0x28   :  { %57 = vadd.xlane.f32.xlu0 %v56_v2  ;;  %v245_v10 = vpack.c.bf16 %v111_v9, %v110_v8  ;;  %v113_v12 = vld [vmem:[#allocation6 + $0x18] sm:$0xff]  ;;  %v223_v30 = vld [vmem:[%s434_s1] ss:$0 sm:$0xff] }
  0x29   :  { %v66_v5 = vsel %vm55_vm0, %v64_v3, 0.0  ;;  %v69_v7 = vsel %vm55_vm0, %v65_v4, 0.0  ;;  %v249_v13 = vpack.c.bf16 %v113_v12, %v112_v11  ;;  %v224_v34 = vld [vmem:[%s435_s2] ss:$0 sm:$0xff]  ;;  %s338_s2 = smov [#allocation8]  }
  0x2a   :  { %67 = vadd.xlane.f32.xlu1 %v66_v5  ;;  %246 = vmatprep.subr.bf16.mxu0 %v245_v10  ;;  %v225_v44 = vld [vmem:[%s437_s4] ss:$0 sm:$0xff]  ;;  %s210_s22 = sshll.u32 %s338_s2, 4  ;;  %s211_s22 = int_to_ptr.vmem [resolvable:$true] %s210_s22 }
  0x2b   :  { %248 = vmatpush3.bf16.msra.mxu0 %v245_v10  ;;  %s306_s23 = scalar_lea.vmem %s211_s22, 256  ;;  %p311_p3 = scmp.lt.s32.totalorder %s211_s22, %s211_s22 }
  0x2c   :  { %60 = vadd.xlane.f32.xlu0 %v59_v6  ;;  %250 = vmatprep.subr.bf16.mxu0 %v249_v13  ;;  %p307_p2 = scmp.ne.s32.totalorder %s211_s22, %s306_s23  ;;  %p312_p4 = scmp.lt.s32.totalorder %s306_s23, %s306_s23 }
  0x2e   :  { %70 = vadd.xlane.f32.xlu1 %v69_v7  ;;  %p313_p5 = por %p312_p4, %p311_p3 }
  0x2f   :  { %252 = vmatpush3.bf16.msra.mxu0 %v249_v13 }
  0x30   :  { %p314_p6 = pnand %p313_p5, %p307_p2 }
  0xb5   :  { %v58_v14 = vpop.xlane.xlu0 %57 }
  0xb6   :  { %v62_v15 = vmul.f32 0.03125, %v58_v14 }
  0xb7   :  { %v68_v16 = vpop.xlane.xlu1 %67 }
  0xb8   :  { %v74_v17 = vmul.f32 %v62_v15, %v62_v15  ;;  %v72_v18 = vmul.f32 0.03125, %v68_v16  ;;  %v93_v32 = vsub.f32 %v53_v0, %v62_v15 }
  0xb9   :  { %v61_v19 = vpop.xlane.xlu0 %60 }
  0xba   :  { %v76_v20 = vsub.f32 %v72_v18, %v74_v17  ;;  %v63_v21 = vmul.f32 0.03125, %v61_v19 }
  0xbb   :  { %v71_v22 = vpop.xlane.xlu1 %70 }
  0xbc   :  { %v78_v23 = vmax.f32 %v76_v20, 0.0  ;;  %v75_v24 = vmul.f32 %v63_v21, %v63_v21  ;;  %v73_v25 = vmul.f32 0.03125, %v71_v22  ;;  %v94_v38 = vsub.f32 %v54_v1, %v63_v21 }
  0xbe   :  { %v80_v26 = vadd.f32 1e-05, %v78_v23  ;;  %v77_v27 = vsub.f32 %v73_v25, %v75_v24 }
  0xc0   :  { %258 = vrsqrt.f32 %v80_v26  ;;  %v79_v28 = vmax.f32 %v77_v27, 0.0 }
  0xc2   :  { %v81_v29 = vadd.f32 1e-05, %v79_v28 }
  0xc4   :  { %260 = vrsqrt.f32 %v81_v29 }
  0xca   :  { %v259_v31 = vpop.eup %258 }
  0xcb   :  { %v91_v33 = vmul.f32 %v259_v31, %v223_v30 }
  0xcd   :  { %v95_v35 = vmul.f32 %v93_v32, %v91_v33 }
  0xce   :  { %v261_v36 = vpop.eup %260 }
  0xcf   :  { %v104_v37 = vadd.f32 %v224_v34, %v95_v35  ;;  %v92_v39 = vmul.f32 %v261_v36, %v223_v30 }
  0xd1   :  { %106 = vst.msk [vmem:[#allocation2] sm:$0xff] %vm55_vm0, %v104_v37  ;;  %v96_v40 = vmul.f32 %v94_v38, %v92_v39 }
  0xd3   :  { %v105_v41 = vadd.f32 %v224_v34, %v96_v40 }
  0xd5   :  { %107 = vst.msk [vmem:[#allocation2 + $0x8] sm:$0xff] %vm55_vm0, %v105_v41 }
  0xd8   :  { %v108_v42 = vld [vmem:[#allocation2] sm:$0xff] }
  0xd9   :  { %242 = vmatprep.mubr.msk.f32.mxu0 %vm55_vm0, %v108_v42 }
  0xdc   :  { %v109_v43 = vld [vmem:[#allocation2 + $0x8] sm:$0xff] }
  0xdd   :  { %243 = vmatmul.mubr.msk.f32.vlgmr.msra.gmra.mrb[0].mxu0 %vm55_vm0, %v109_v43 }
 0x1b0   :  { %v244_v45 = vpop.f32.mrb[0].mxu0 }
 0x1b1   :  { %v200_v46 = vadd.f32 %v244_v45, %v225_v44  ;;  %v194_v47 = vpop.f32.mrb[1].mxu0 }
 0x1b2   :  { %v195_v48 = vadd.f32 %v225_v44, %v194_v47 }
 0x1b3   :  { %204 = vst.msk [vmem:[#allocation8 + $0x8] sm:$0xff] %vm55_vm0, %v200_v46 }
 0x1b4   :  { %203 = vst.msk [vmem:[#allocation8] sm:$0xff] %vm55_vm0, %v195_v48 }
 0x1b5   :  { %317 = shalt.err (!%p314_p6)
}
 0x1b6   :  { %s318_s25 = scalar_lea.hbm %s438_s5, 256 }
 0x1b7   :  { %p319_p7 = scmp.ne.s32.totalorder %s438_s5, %s318_s25  ;;  %p322_p8 = scmp.lt.u32.totalorder %s318_s25, %s438_s5 }
 0x1b9   :  { %p324_p9 = pnand %p322_p8, %p319_p7 }
 0x1bb   :  { %327 = shalt.err (!%p324_p9)
}
 0x1bc   :  { %216 = dma.vmem_to_hbm [thread:$0]  %s211_s22, 256, %s438_s5, [#allocation5], %s335_s28, %s335_s28, %s336_s29  }
 0x1bd   :  { %332 = dma.done.wait [#allocation5], 256  }
 0x1be   :  { %333 = vsyncadd [#allocation5], 4294967040 }
 0x1bf   :  { %220 = vsyncpa [#allocation4], 1 }
 0x1c0   :  { %221 = vsyncpa [#allocation7], 1 }
 0x1c1   :  { %222 = vsyncpa [#allocation5], 1 }

</bundles_post_ra>
